<compile_context>
chip_gen: v7x
topology: tpu7x:2x2x1
jax: 0.10.0
libtpu: 0.0.40
codegen_flags: <defaults>
</compile_context>

<pallas_src>
import functools

import jax
import jax.numpy as jnp
from jax.experimental import pallas as pl
from jax.experimental.pallas import tpu as pltpu


# ---------------------------------------------------------------------------
# Kernel
# ---------------------------------------------------------------------------
def _mlp_kernel(num_layers, x_ref, w_ref, b_ref, out_ref):
    """Fused padded MLP forward for one batch tile.

    x_ref:   (TB, Dp)          activations (padded to 128 lanes)
    w_ref:   (L, Dp, Dp)       packed, zero-padded weights, (in, out) layout
    b_ref:   (L, 1, Dp)        packed, zero-padded biases
    out_ref: (TB, Dp)          lane-dense padded output
    Hidden layers: ReLU; final layer: Tanh (matches ActorNetwork).
    """
    compute_dtype = w_ref.dtype
    h = x_ref[...]
    if h.dtype != compute_dtype:
        h = h.astype(compute_dtype)

    for li in range(num_layers):
        # MXU matmul in the storage dtype (f32 or bf16) with f32 accumulation.
        acc = jnp.dot(h, w_ref[li], preferred_element_type=jnp.float32)
        acc = acc + b_ref[li].astype(jnp.float32)          # (1, Dp) broadcast
        if li < num_layers - 1:
            # ReLU in f32 on the VPU, cast back for the next MXU operand.
            h = jnp.maximum(acc, 0.0).astype(compute_dtype)
        else:
            # Tanh in f32 on the EUP (v5e has no bf16 EUP path).
            h = jnp.tanh(acc)

    out_ref[...] = h.astype(out_ref.dtype)


# ---------------------------------------------------------------------------
# Wrapper
# ---------------------------------------------------------------------------
def _round_up(x, m):
    return ((x + m - 1) // m) * m


def actor_forward(x, w_stack, b_stack, d_actions, *, tile_b=None):
    """x: (B, d_in); w_stack: (L, Dp, Dp); b_stack: (L, 1, Dp). Returns (B, d_actions)."""
    num_layers, d_pad, _ = w_stack.shape
    batch, d_in = x.shape

    # Auto tile: single tile for small batches (no grid overhead / no wasted rows),
    # 128-row tiles (full MXU rows, megacore-shardable) for large batches.
    if tile_b is None:
        tile_b = min(128, _round_up(batch, 8))
    tile_b = _round_up(tile_b, 8)

    # Pad batch to a multiple of the tile and features to the padded lane width.
    b_pad = _round_up(batch, tile_b)
    xp = jnp.zeros((b_pad, d_pad), x.dtype).at[:batch, :d_in].set(x)

    grid = (b_pad // tile_b,)
    kernel = functools.partial(_mlp_kernel, num_layers)

    itemsz = jnp.dtype(w_stack.dtype).itemsize
    flops = 2 * b_pad * num_layers * d_pad * d_pad
    bytes_accessed = (
        w_stack.size * itemsz
        + b_stack.size * itemsz
        + 2 * b_pad * d_pad * jnp.dtype(x.dtype).itemsize  # x in + out
    )

    out_padded = pl.pallas_call(
        kernel,
        out_shape=jax.ShapeDtypeStruct((b_pad, d_pad), x.dtype),
        grid=grid,
        in_specs=[
            # Batch tile of activations (lane-dense, 128 wide).
            pl.BlockSpec((tile_b, d_pad), lambda i: (i, 0)),
            # Whole packed weight stack: constant block index -> DMA'd once,
            # resident in VMEM across all grid steps.
            pl.BlockSpec((num_layers, d_pad, d_pad), lambda i: (0, 0, 0)),
            pl.BlockSpec((num_layers, 1, d_pad), lambda i: (0, 0, 0)),
        ],
        out_specs=pl.BlockSpec((tile_b, d_pad), lambda i: (i, 0)),
        compiler_params=pltpu.CompilerParams(
            dimension_semantics=("parallel",)),
        cost_estimate=pl.CostEstimate(
            flops=flops,
            transcendentals=b_pad * d_pad,       # final tanh
            bytes_accessed=bytes_accessed),
    )(xp, w_stack, b_stack)

    # Slice away batch / lane padding outside the kernel (kernel store stays unmasked).
    return out_padded[:batch, :d_actions]


# ---------------------------------------------------------------------------
# Parameter init / packing / reference
# ---------------------------------------------------------------------------
def init_actor_params(key, d_obs, d_goal, d_actions, hidden_layer_sizes,
                      dtype=jnp.float32):
    """Deterministic init mirroring nn.Linear's default U(-1/sqrt(fan_in), ...)."""
    sizes = [d_obs + d_goal + 1] + list(hidden_layer_sizes) + [d_actions]
    params = []
    for i in range(len(sizes) - 1):
        fan_in, fan_out = sizes[i], sizes[i + 1]
        key, kw, kb = jax.random.split(key, 3)
        bound = 1.0 / jnp.sqrt(jnp.asarray(fan_in, dtype=jnp.float32))
        w = jax.random.uniform(kw, (fan_in, fan_out), dtype, -bound, bound)
        b = jax.random.uniform(kb, (1, fan_out), dtype, -bound, bound)
        params.append((w, b))
    return params


def pack_params(params, dtype=jnp.float32, lane=128):
    """Pack per-layer (W:(in,out), b:(1,out)) into one zero-padded stack.

    W_stack: (L, Dp, Dp), b_stack: (L, 1, Dp) with Dp = max dim rounded up to 128.
    Zero padding keeps the math identical (padded lanes contribute 0).
    """
    max_dim = max(max(w.shape) for w, _ in params)
    d_pad = _round_up(max_dim, lane)
    num_layers = len(params)
    w_stack = jnp.zeros((num_layers, d_pad, d_pad), dtype)
    b_stack = jnp.zeros((num_layers, 1, d_pad), dtype)
    for li, (w, b) in enumerate(params):
        fin, fout = w.shape
        w_stack = w_stack.at[li, :fin, :fout].set(w.astype(dtype))
        b_stack = b_stack.at[li, 0, :fout].set(b.reshape(-1).astype(dtype))
    return w_stack, b_stack


def actor_forward_ref(x, params):
    """Plain-JAX f32 reference (same math) for a sanity check."""
    h = x
    for i, (w, b) in enumerate(params):
        h = h @ w + b
        h = jnp.maximum(h, 0.0) if i < len(params) - 1 else jnp.tanh(h)
    return h


# ---------------------------------------------------------------------------
if __name__ == "__main__":
    d_obs, d_goal, d_actions = 20, 11, 8          # input dim = d_obs + d_goal + 1 = 32
    hidden_layer_sizes = [32, 32]
    batch = 64

    key = jax.random.PRNGKey(0)
    key, kx = jax.random.split(key)
    d_in = d_obs + d_goal + 1
    x = jax.random.normal(kx, (batch, d_in), jnp.float32)
    params = init_actor_params(key, d_obs, d_goal, d_actions, hidden_layer_sizes)
    ref = actor_forward_ref(x, params)

    # f32 packed path, auto tile (single grid step for batch=64): exact match.
    w_f32, b_f32 = pack_params(params, dtype=jnp.float32)
    out = actor_forward(x, w_f32, b_f32, d_actions)
    out = jax.block_until_ready(out)
    assert out.shape == (batch, d_actions)
    assert jnp.allclose(out, ref, atol=1e-5, rtol=1e-5)

    # Explicitly gridded path (2 grid steps) exercises the "parallel" batch axis.
    out_grid = actor_forward(x, w_f32, b_f32, d_actions, tile_b=32)
    out_grid = jax.block_until_ready(out_grid)
    assert jnp.allclose(out_grid, ref, atol=1e-5, rtol=1e-5)

    # bf16 packed path: half the weight/activation DMA bytes, f32 accumulation.
    w_bf16, b_bf16 = pack_params(params, dtype=jnp.bfloat16)
    out_bf16 = actor_forward(x.astype(jnp.bfloat16), w_bf16, b_bf16, d_actions)
    out_bf16 = jax.block_until_ready(out_bf16)
    assert out_bf16.shape == (batch, d_actions)
    assert jnp.allclose(out_bf16.astype(jnp.float32), ref, atol=1e-1)

    print("KERNEL_OK")
</pallas_src>

<mosaic_0001>
module attributes {stable_mosaic.version = 11 : i64} {
  func.func @_mlp_kernel(%arg0: i32, %arg1: memref<64x128xf32, #tpu.memory_space<vmem>>, %arg2: memref<3x128x128xf32, #tpu.memory_space<vmem>>, %arg3: memref<3x1x128xf32, #tpu.memory_space<vmem>>, %arg4: memref<64x128xf32, #tpu.memory_space<vmem>>) attributes {dimension_semantics = [#tpu.dimension_semantics<parallel>], iteration_bounds = array<i64: 1>, scalar_prefetch = 0 : i64, scratch_operands = 0 : i64, tpu.core_type = #tpu.core_type<tc>, window_params = [{transform_indices = @transform_0, window_bounds = array<i64: 64, 128>}, {pipeline_mode = #tpu.pipeline_mode<synchronous>, transform_indices = @transform_1, window_bounds = array<i64: 3, 128, 128>}, {pipeline_mode = #tpu.pipeline_mode<synchronous>, transform_indices = @transform_2, window_bounds = array<i64: 3, 1, 128>}, {transform_indices = @transform_3, window_bounds = array<i64: 64, 128>}]} {
    %c0 = arith.constant 0 : index
    %c0_0 = arith.constant 0 : index
    %0 = vector.load %arg1[%c0, %c0_0] : memref<64x128xf32, #tpu.memory_space<vmem>>, vector<64x128xf32>
    %c0_1 = arith.constant 0 : index
    %c0_2 = arith.constant 0 : index
    %c0_3 = arith.constant 0 : index
    %1 = vector.load %arg2[%c0_1, %c0_2, %c0_3] : memref<3x128x128xf32, #tpu.memory_space<vmem>>, vector<1x128x128xf32>
    %2 = vector.shape_cast %1 : vector<1x128x128xf32> to vector<128x128xf32>
    %cst = arith.constant dense<0.000000e+00> : vector<64x128xf32>
    %3 = tpu.matmul %0, %2, %cst {dimension_numbers = #tpu.dot_dimension_numbers<[1], [0], [0], [1], [0, 0, 1, 1], [], []>} : vector<64x128xf32>, vector<128x128xf32>, vector<64x128xf32> -> vector<64x128xf32>
    %c0_4 = arith.constant 0 : index
    %c0_5 = arith.constant 0 : index
    %c0_6 = arith.constant 0 : index
    %4 = vector.load %arg3[%c0_4, %c0_5, %c0_6] : memref<3x1x128xf32, #tpu.memory_space<vmem>>, vector<1x1x128xf32>
    %5 = vector.shape_cast %4 : vector<1x1x128xf32> to vector<1x128xf32>
    %6 = vector.broadcast %5 : vector<1x128xf32> to vector<64x128xf32>
    %7 = arith.addf %3, %6 : vector<64x128xf32>
    %cst_7 = arith.constant 0.000000e+00 : f32
    %8 = vector.broadcast %cst_7 : f32 to vector<64x128xf32>
    %9 = arith.maximumf %7, %8 : vector<64x128xf32>
    %c1 = arith.constant 1 : index
    %c0_8 = arith.constant 0 : index
    %c0_9 = arith.constant 0 : index
    %10 = vector.load %arg2[%c1, %c0_8, %c0_9] : memref<3x128x128xf32, #tpu.memory_space<vmem>>, vector<1x128x128xf32>
    %11 = vector.shape_cast %10 : vector<1x128x128xf32> to vector<128x128xf32>
    %cst_10 = arith.constant dense<0.000000e+00> : vector<64x128xf32>
    %12 = tpu.matmul %9, %11, %cst_10 {dimension_numbers = #tpu.dot_dimension_numbers<[1], [0], [0], [1], [0, 0, 1, 1], [], []>} : vector<64x128xf32>, vector<128x128xf32>, vector<64x128xf32> -> vector<64x128xf32>
    %c1_11 = arith.constant 1 : index
    %c0_12 = arith.constant 0 : index
    %c0_13 = arith.constant 0 : index
    %13 = vector.load %arg3[%c1_11, %c0_12, %c0_13] : memref<3x1x128xf32, #tpu.memory_space<vmem>>, vector<1x1x128xf32>
    %14 = vector.shape_cast %13 : vector<1x1x128xf32> to vector<1x128xf32>
    %15 = vector.broadcast %14 : vector<1x128xf32> to vector<64x128xf32>
    %16 = arith.addf %12, %15 : vector<64x128xf32>
    %cst_14 = arith.constant 0.000000e+00 : f32
    %17 = vector.broadcast %cst_14 : f32 to vector<64x128xf32>
    %18 = arith.maximumf %16, %17 : vector<64x128xf32>
    %c2 = arith.constant 2 : index
    %c0_15 = arith.constant 0 : index
    %c0_16 = arith.constant 0 : index
    %19 = vector.load %arg2[%c2, %c0_15, %c0_16] : memref<3x128x128xf32, #tpu.memory_space<vmem>>, vector<1x128x128xf32>
    %20 = vector.shape_cast %19 : vector<1x128x128xf32> to vector<128x128xf32>
    %cst_17 = arith.constant dense<0.000000e+00> : vector<64x128xf32>
    %21 = tpu.matmul %18, %20, %cst_17 {dimension_numbers = #tpu.dot_dimension_numbers<[1], [0], [0], [1], [0, 0, 1, 1], [], []>} : vector<64x128xf32>, vector<128x128xf32>, vector<64x128xf32> -> vector<64x128xf32>
    %c2_18 = arith.constant 2 : index
    %c0_19 = arith.constant 0 : index
    %c0_20 = arith.constant 0 : index
    %22 = vector.load %arg3[%c2_18, %c0_19, %c0_20] : memref<3x1x128xf32, #tpu.memory_space<vmem>>, vector<1x1x128xf32>
    %23 = vector.shape_cast %22 : vector<1x1x128xf32> to vector<1x128xf32>
    %24 = vector.broadcast %23 : vector<1x128xf32> to vector<64x128xf32>
    %25 = arith.addf %21, %24 : vector<64x128xf32>
    %26 = math.tanh %25 : vector<64x128xf32>
    %c0_21 = arith.constant 0 : index
    %c0_22 = arith.constant 0 : index
    %27 = vector.load %arg4[%c0_21, %c0_22] : memref<64x128xf32, #tpu.memory_space<vmem>>, vector<64x128xf32>
    tpu.vector_store %arg4[%c0_21, %c0_22], %26 {strides = array<i32>} : memref<64x128xf32, #tpu.memory_space<vmem>>, vector<64x128xf32>,
    return
  }
  func.func @transform_0(%arg0: i32) -> (i32, i32) {
    %c0_i32 = arith.constant 0 : i32
    %c0_i32_0 = arith.constant 0 : i32
    return %arg0, %c0_i32 : i32, i32
  }
  func.func @transform_1(%arg0: i32) -> (i32, i32, i32) {
    %c0_i32 = arith.constant 0 : i32
    %c0_i32_0 = arith.constant 0 : i32
    %c0_i32_1 = arith.constant 0 : i32
    %c0_i32_2 = arith.constant 0 : i32
    return %c0_i32, %c0_i32_0, %c0_i32_1 : i32, i32, i32
  }
  func.func @transform_2(%arg0: i32) -> (i32, i32, i32) {
    %c0_i32 = arith.constant 0 : i32
    %c0_i32_0 = arith.constant 0 : i32
    %c0_i32_1 = arith.constant 0 : i32
    %c0_i32_2 = arith.constant 0 : i32
    return %c0_i32, %c0_i32_0, %c0_i32_1 : i32, i32, i32
  }
  func.func @transform_3(%arg0: i32) -> (i32, i32) {
    %c0_i32 = arith.constant 0 : i32
    %c0_i32_0 = arith.constant 0 : i32
    return %arg0, %c0_i32 : i32, i32
  }
}

</mosaic_0001>

<bundles_post_ra>
// kernel: tpu_custom_call.1
= control target key start
LH: loop header
LB: loop body
LE: loop exit
PB: predicated region body
PF: predicated region fallthrough
CT: control target
= control target key end

     0   :  { %8 = vsyncpa [#allocation3], 0  ;;  %s982_s0 = inlined_call_operand.hbm [shape: f32[64,128], index: 0, kind: input, shape index: {}]   ;;  %s983_s1 = inlined_call_operand.hbm [shape: f32[3,128,128], index: 1, kind: input, shape index: {}]   ;;  %s984_s2 = inlined_call_operand.vmem [shape: f32[3,1,128], index: 2, kind: input, shape index: {}]   ;;  %s985_s3 = inlined_call_operand.hbm [shape: f32[64,128], index: 3, kind: output, shape index: {}]  }
   0x1   :  { %9 = vsyncpa [#allocation6], 0 }
   0x2   :  { %10 = vsyncpa [#allocation4], 0  ;;  %s903_s12 = smov [#allocation2]   ;;  %s831_s16 = scalar_lea.hbm %s982_s0, 1024 }
   0x3   :  { %s16_s13 = sshll.u32 %s903_s12, 4  ;;  %p832_p0 = scmp.ne.s32.totalorder %s982_s0, %s831_s16  ;;  %s17_s13 = int_to_ptr.vmem [resolvable:$true] %s16_s13 }
   0x4   :  { %p835_p1 = scmp.lt.u32.totalorder %s831_s16, %s982_s0 }
   0x6   :  { %p837_p2 = pnand %p835_p1, %p832_p0 }
   0x8   :  { %840 = shalt.err (!%p837_p2)
}
   0x9   :  { %s841_s21 = scalar_lea.vmem %s17_s13, 1024  ;;  %p846_p4 = scmp.lt.s32.totalorder %s17_s13, %s17_s13 }
   0xa   :  { %p842_p3 = scmp.ne.s32.totalorder %s17_s13, %s841_s21  ;;  %p847_p5 = scmp.lt.s32.totalorder %s841_s21, %s841_s21 }
   0xc   :  { %p848_p6 = por %p847_p5, %p846_p4 }
   0xe   :  { %p849_p7 = pnand %p848_p6, %p842_p3 }
  0x10   :  { %852 = shalt.err (!%p849_p7)
}
  0x11   :  { %s904_s22 = smov 128   ;;  %s905_s23 = smov 8  }
  0x12   :  { %22 = dma.hbm_to_vmem [thread:$0]  %s982_s0, 1024, %s17_s13, [#allocation3], %s904_s22, %s904_s22, %s905_s23  }
  0x13   :  { %s906_s26 = smov [#allocation5]   ;;  %s853_s30 = scalar_lea.hbm %s983_s1, 6144 }
  0x14   :  { %s28_s27 = sshll.u32 %s906_s26, 4  ;;  %p854_p8 = scmp.ne.s32.totalorder %s983_s1, %s853_s30  ;;  %s29_s27 = int_to_ptr.vmem [resolvable:$true] %s28_s27 }
  0x15   :  { %p857_p9 = scmp.lt.u32.totalorder %s853_s30, %s983_s1 }
  0x17   :  { %p859_p10 = pnand %p857_p9, %p854_p8 }
  0x19   :  { %862 = shalt.err (!%p859_p10)
}
  0x1a   :  { %s863_s8 = scalar_lea.vmem %s29_s27, 6144  ;;  %p868_p12 = scmp.lt.s32.totalorder %s29_s27, %s29_s27 }
  0x1b   :  { %p864_p11 = scmp.ne.s32.totalorder %s29_s27, %s863_s8  ;;  %p869_p13 = scmp.lt.s32.totalorder %s863_s8, %s863_s8 }
  0x1d   :  { %p870_p0 = por %p869_p13, %p868_p12 }
  0x1f   :  { %p871_p1 = pnand %p870_p0, %p864_p11 }
  0x21   :  { %874 = shalt.err (!%p871_p1)
}
  0x22   :  { %34 = dma.hbm_to_vmem [thread:$0]  %s983_s1, 6144, %s29_s27, [#allocation6], %s904_s22, %s904_s22, %s905_s23  }
  0x23   :  { %897 = dma.done.wait [#allocation3], 1024  }
  0x24   :  { %898 = vsyncadd [#allocation3], 4294966272 }
  0x25   :  { %899 = dma.done.wait [#allocation6], 6144  }
  0x26   :  { %900 = vsyncadd [#allocation6], 4294961152  ;;  %v51_v0 = vld [vmem:[#allocation5] sm:$0xff]  ;;  %v52_v1 = vld [vmem:[#allocation5 + $0x8] sm:$0xff] }
  0x27   :  { %v53_v2 = vld [vmem:[#allocation5 + $0x10] sm:$0xff]  ;;  %v698_v3 = vpack.c.bf16 %v52_v1, %v51_v0  ;;  %v54_v4 = vld [vmem:[#allocation5 + $0x18] sm:$0xff]  ;;  %v55_v6 = vld [vmem:[#allocation5 + $0x20] sm:$0xff] }
  0x28   :  { %v702_v5 = vpack.c.bf16 %v54_v4, %v53_v2  ;;  %v56_v7 = vld [vmem:[#allocation5 + $0x28] sm:$0xff]  ;;  %v43_v9 = vld [vmem:[#allocation2] sm:$0xff]  ;;  %v57_v10 = vld [vmem:[#allocation5 + $0x30] sm:$0xff] }
  0x29   :  { %699 = vmatprep.subr.bf16.mxu0 %v698_v3  ;;  %v706_v8 = vpack.c.bf16 %v56_v7, %v55_v6  ;;  %v58_v11 = vld [vmem:[#allocation5 + $0x38] sm:$0xff]  ;;  %598 = vmatprep.mubr.f32.mxu0 %v43_v9  ;;  %v188_v12 = vld [vmem:[#allocation5 + $0x80] sm:$0xff]  ;;  %v189_v13 = vld [vmem:[#allocation5 + $0x88] sm:$0xff] }
  0x2a   :  { %701 = vmatpush3.bf16.msra.mxu0 %v698_v3  ;;  %v190_v14 = vld [vmem:[#allocation5 + $0x90] sm:$0xff]  ;;  %v710_v15 = vpack.c.bf16 %v58_v11, %v57_v10  ;;  %v59_v16 = vld [vmem:[#allocation5 + $0x40] sm:$0xff]  ;;  %v730_v17 = vpack.c.bf16 %v189_v13, %v188_v12  ;;  %v191_v18 = vld [vmem:[#allocation5 + $0x98] sm:$0xff] }
  0x2b   :  { %703 = vmatprep.subr.bf16.mxu0 %v702_v5  ;;  %v60_v19 = vld [vmem:[#allocation5 + $0x48] sm:$0xff]  ;;  %v734_v20 = vpack.c.bf16 %v191_v18, %v190_v14  ;;  %v192_v21 = vld [vmem:[#allocation5 + $0xa0] sm:$0xff]  ;;  %v61_v24 = vld [vmem:[#allocation5 + $0x50] sm:$0xff] }
  0x2c   :  { %v193_v22 = vld [vmem:[#allocation5 + $0xa8] sm:$0xff]  ;;  %731 = vmatprep.subr.bf16.mxu1 %v730_v17  ;;  %v714_v23 = vpack.c.bf16 %v60_v19, %v59_v16  ;;  %v62_v26 = vld [vmem:[#allocation5 + $0x58] sm:$0xff]  ;;  %v194_v27 = vld [vmem:[#allocation5 + $0xb0] sm:$0xff] }
  0x2d   :  { %733 = vmatpush3.bf16.msra.mxu1 %v730_v17  ;;  %v738_v25 = vpack.c.bf16 %v193_v22, %v192_v21  ;;  %v195_v28 = vld [vmem:[#allocation5 + $0xb8] sm:$0xff]  ;;  %v718_v29 = vpack.c.bf16 %v62_v26, %v61_v24  ;;  %v63_v30 = vld [vmem:[#allocation5 + $0x60] sm:$0xff]  ;;  %v64_v32 = vld [vmem:[#allocation5 + $0x68] sm:$0xff] }
  0x2e   :  { %705 = vmatpush3.bf16.msra.mxu0 %v702_v5  ;;  %735 = vmatprep.subr.bf16.mxu1 %v734_v20  ;;  %v742_v31 = vpack.c.bf16 %v195_v28, %v194_v27  ;;  %v196_v33 = vld [vmem:[#allocation5 + $0xc0] sm:$0xff]  ;;  %v197_v34 = vld [vmem:[#allocation5 + $0xc8] sm:$0xff]  ;;  %v722_v35 = vpack.c.bf16 %v64_v32, %v63_v30  ;;  %v65_v36 = vld [vmem:[#allocation5 + $0x70] sm:$0xff] }
  0x2f   :  { %707 = vmatprep.subr.bf16.mxu0 %v706_v8  ;;  %v746_v37 = vpack.c.bf16 %v197_v34, %v196_v33  ;;  %v66_v38 = vld [vmem:[#allocation5 + $0x78] sm:$0xff]  ;;  %v198_v39 = vld [vmem:[#allocation5 + $0xd0] sm:$0xff]  ;;  %v200_v43 = vld [vmem:[#allocation5 + $0xe0] sm:$0xff] }
  0x30   :  { %v199_v40 = vld [vmem:[#allocation5 + $0xd8] sm:$0xff]  ;;  %v726_v41 = vpack.c.bf16 %v66_v38, %v65_v36  ;;  %v201_v44 = vld [vmem:[#allocation5 + $0xe8] sm:$0xff]  ;;  %v45_v47 = vld [vmem:[#allocation2 + $0x10] sm:$0xff] }
  0x31   :  { %737 = vmatpush3.bf16.msra.mxu1 %v734_v20  ;;  %v750_v42 = vpack.c.bf16 %v199_v40, %v198_v39  ;;  %v754_v45 = vpack.c.bf16 %v201_v44, %v200_v43  ;;  %v44_v46 = vld [vmem:[#allocation2 + $0x8] sm:$0xff]  ;;  %v46_v48 = vld [vmem:[#allocation2 + $0x18] sm:$0xff]  ;;  %v47_v49 = vld [vmem:[#allocation2 + $0x20] sm:$0xff] }
  0x32   :  { %709 = vmatpush3.bf16.msra.mxu0 %v706_v8  ;;  %739 = vmatprep.subr.bf16.mxu1 %v738_v25  ;;  %v48_v50 = vld [vmem:[#allocation2 + $0x28] sm:$0xff]  ;;  %v49_v51 = vld [vmem:[#allocation2 + $0x30] sm:$0xff]  ;;  %v50_v52 = vld [vmem:[#allocation2 + $0x38] sm:$0xff] }
  0x33   :  { %711 = vmatprep.subr.bf16.mxu0 %v710_v15  ;;  %v202_v53 = vld [vmem:[#allocation5 + $0xf0] sm:$0xff]  ;;  %v203_v54 = vld [vmem:[#allocation5 + $0xf8] sm:$0xff]  ;;  %v326_v56 = vld [vmem:[#allocation5 + $0x100] sm:$0xff] }
  0x34   :  { %v758_v55 = vpack.c.bf16 %v203_v54, %v202_v53  ;;  %v327_v57 = vld [vmem:[#allocation5 + $0x108] sm:$0xff]  ;;  %v328_v58 = vld [vmem:[#allocation5 + $0x110] sm:$0xff]  ;;  %v329_v60 = vld [vmem:[#allocation5 + $0x118] sm:$0xff] }
  0x35   :  { %741 = vmatpush3.bf16.msra.mxu1 %v738_v25  ;;  %v762_v59 = vpack.c.bf16 %v327_v57, %v326_v56  ;;  %v766_v61 = vpack.c.bf16 %v329_v60, %v328_v58  ;;  %v330_v62 = vld [vmem:[#allocation5 + $0x120] sm:$0xff]  ;;  %v331_v63 = vld [vmem:[#allocation5 + $0x128] sm:$0xff]  ;;  %v332_v1 = vld [vmem:[#allocation5 + $0x130] sm:$0xff] }
  0x36   :  { %713 = vmatpush3.bf16.msra.mxu0 %v710_v15  ;;  %743 = vmatprep.subr.bf16.mxu1 %v742_v31  ;;  %v770_v0 = vpack.c.bf16 %v331_v63, %v330_v62  ;;  %v333_v2 = vld [vmem:[#allocation5 + $0x138] sm:$0xff]  ;;  %v334_v4 = vld [vmem:[#allocation5 + $0x140] sm:$0xff]  ;;  %v335_v5 = vld [vmem:[#allocation5 + $0x148] sm:$0xff] }
  0x37   :  { %715 = vmatprep.subr.bf16.mxu0 %v714_v23  ;;  %v774_v3 = vpack.c.bf16 %v333_v2, %v332_v1  ;;  %v778_v6 = vpack.c.bf16 %v335_v5, %v334_v4  ;;  %v336_v7 = vld [vmem:[#allocation5 + $0x150] sm:$0xff]  ;;  %v337_v8 = vld [vmem:[#allocation5 + $0x158] sm:$0xff]  ;;  %v338_v10 = vld [vmem:[#allocation5 + $0x160] sm:$0xff] }
  0x38   :  { %v782_v9 = vpack.c.bf16 %v337_v8, %v336_v7  ;;  %v339_v11 = vld [vmem:[#allocation5 + $0x168] sm:$0xff]  ;;  %v489_v13 = vld [vmem:[%s984_s2] ss:$0 sm:$0xff]  ;;  %v340_v38 = vld [vmem:[#allocation5 + $0x170] sm:$0xff] }
  0x39   :  { %745 = vmatpush3.bf16.msra.mxu1 %v742_v31  ;;  %v786_v12 = vpack.c.bf16 %v339_v11, %v338_v10  ;;  %v341_v39 = vld [vmem:[#allocation5 + $0x178] sm:$0xff]  ;;  %v493_v2 = vld [vmem:[%s984_s2 + $0x2] ss:$0 sm:$0xff] }
  0x3a   :  { %717 = vmatpush3.bf16.msra.mxu0 %v714_v23  ;;  %747 = vmatprep.subr.bf16.mxu1 %v746_v37  ;;  %v790_v40 = vpack.c.bf16 %v341_v39, %v340_v38 }
  0x3b   :  { %719 = vmatprep.subr.bf16.mxu0 %v718_v29 }
  0x3d   :  { %749 = vmatpush3.bf16.msra.mxu1 %v746_v37 }
  0x3e   :  { %721 = vmatpush3.bf16.msra.mxu0 %v718_v29  ;;  %751 = vmatprep.subr.bf16.mxu1 %v750_v42 }
  0x3f   :  { %723 = vmatprep.subr.bf16.mxu0 %v722_v35 }
  0x41   :  { %753 = vmatpush3.bf16.msra.mxu1 %v750_v42 }
  0x42   :  { %725 = vmatpush3.bf16.msra.mxu0 %v722_v35  ;;  %755 = vmatprep.subr.bf16.mxu1 %v754_v45 }
  0x43   :  { %727 = vmatprep.subr.bf16.mxu0 %v726_v41 }
  0x45   :  { %757 = vmatpush3.bf16.msra.mxu1 %v754_v45 }
  0x46   :  { %729 = vmatpush3.bf16.msra.mxu0 %v726_v41  ;;  %759 = vmatprep.subr.bf16.mxu1 %v758_v55  ;;  %v491_v41 = vld [vmem:[%s984_s2 + $0x1] ss:$0 sm:$0xff]  ;;  %s907_s2 = smov [#allocation7]  }
  0x47   :  { %763 = vmatprep.subr.bf16.mxu0 %v762_v59  ;;  %s476_s15 = sshll.u32 %s907_s2, 4  ;;  %s477_s15 = int_to_ptr.vmem [resolvable:$true] %s476_s15 }
  0x48   :  { %s875_s16 = scalar_lea.vmem %s477_s15, 1024  ;;  %p880_p3 = scmp.lt.s32.totalorder %s477_s15, %s477_s15 }
  0x49   :  { %599 = vmatmul.mubr.f32.vlgmr.msra.gmra.mrb[0].mxu0 %v44_v46  ;;  %761 = vmatpush3.bf16.msra.mxu1 %v758_v55  ;;  %p876_p2 = scmp.ne.s32.totalorder %s477_s15, %s875_s16  ;;  %p881_p4 = scmp.lt.s32.totalorder %s875_s16, %s875_s16 }
  0x4a   :  { %601 = vmatprep.mubr.f32.mxu0 %v45_v47  ;;  %794 = vmatprep.subr.bf16.mxu1 %v762_v59 }
  0x4b   :  { %765 = vmatpush3.bf16.msra.mxu0 %v762_v59  ;;  %p882_p5 = por %p881_p4, %p880_p3 }
  0x4c   :  { %767 = vmatprep.subr.bf16.mxu0 %v766_v61 }
  0x4d   :  { %602 = vmatmul.mubr.f32.gmra.mrb[2].mxu0 %v46_v48  ;;  %p883_p6 = pnand %p882_p5, %p876_p2 }
  0x4e   :  { %604 = vmatprep.mubr.f32.mxu0 %v47_v49 }
  0x4f   :  { %769 = vmatpush3.bf16.msra.mxu0 %v766_v61 }
  0x50   :  { %771 = vmatprep.subr.bf16.mxu0 %v770_v0 }
  0x51   :  { %605 = vmatmul.mubr.f32.gmra.mrb[4].mxu0 %v48_v50 }
  0x52   :  { %607 = vmatprep.mubr.f32.mxu0 %v49_v51 }
  0x53   :  { %773 = vmatpush3.bf16.msra.mxu0 %v770_v0 }
  0x54   :  { %775 = vmatprep.subr.bf16.mxu0 %v774_v3 }
  0x55   :  { %608 = vmatmul.mubr.f32.gmra.mrb[6].mxu0 %v50_v52 }
  0x57   :  { %777 = vmatpush3.bf16.msra.mxu0 %v774_v3 }
  0x58   :  { %779 = vmatprep.subr.bf16.mxu0 %v778_v6 }
  0x5b   :  { %781 = vmatpush3.bf16.msra.mxu0 %v778_v6 }
  0x5c   :  { %783 = vmatprep.subr.bf16.mxu0 %v782_v9 }
  0x5f   :  { %785 = vmatpush3.bf16.msra.mxu0 %v782_v9 }
  0x60   :  { %787 = vmatprep.subr.bf16.mxu0 %v786_v12 }
  0x63   :  { %789 = vmatpush3.bf16.msra.mxu0 %v786_v12 }
  0x64   :  { %791 = vmatprep.subr.bf16.mxu0 %v790_v40 }
  0x67   :  { %793 = vmatpush3.bf16.msra.mxu0 %v790_v40 }
 0x11c   :  { %v600_v14 = vpop.f32.mrb[0].mxu0 }
 0x11d   :  { %v146_v15 = vadd.f32 %v600_v14, %v489_v13  ;;  %v140_v16 = vpop.f32.mrb[1].mxu0 }
 0x11e   :  { %v141_v17 = vadd.f32 %v489_v13, %v140_v16 }
 0x11f   :  { %v180_v20 = vmax.f32 %v146_v15, 0.0 }
 0x120   :  { %v603_v18 = vpop.f32.mrb[2].mxu0  ;;  %v179_v19 = vmax.f32 %v141_v17, 0.0 }
 0x121   :  { %v156_v21 = vadd.f32 %v603_v18, %v489_v13  ;;  %v150_v22 = vpop.f32.mrb[3].mxu0 }
 0x122   :  { %v151_v23 = vadd.f32 %v489_v13, %v150_v22  ;;  %642 = vmatprep.mubr.f32.mxu1 %v179_v19 }
 0x123   :  { %643 = vmatmul.mubr.f32.vlgmr.msra.gmra.mrb[0].mxu1 %v180_v20  ;;  %v182_v26 = vmax.f32 %v156_v21, 0.0 }
 0x124   :  { %v181_v24 = vmax.f32 %v151_v23, 0.0  ;;  %v606_v25 = vpop.f32.mrb[4].mxu0  ;;  %802 = vmatpush3.bf16.msra.mxu1 %v762_v59 }
 0x125   :  { %v166_v27 = vadd.f32 %v606_v25, %v489_v13  ;;  %v160_v28 = vpop.f32.mrb[5].mxu0  ;;  %795 = vmatprep.subr.bf16.mxu1 %v766_v61 }
 0x126   :  { %v161_v29 = vadd.f32 %v489_v13, %v160_v28  ;;  %645 = vmatprep.mubr.f32.mxu1 %v181_v24 }
 0x127   :  { %646 = vmatmul.mubr.f32.gmra.mrb[2].mxu1 %v182_v26  ;;  %v184_v32 = vmax.f32 %v166_v27, 0.0 }
 0x128   :  { %v183_v30 = vmax.f32 %v161_v29, 0.0  ;;  %v609_v31 = vpop.f32.mrb[6].mxu0  ;;  %803 = vmatpush3.bf16.msra.mxu1 %v766_v61 }
 0x129   :  { %v176_v33 = vadd.f32 %v609_v31, %v489_v13  ;;  %v170_v34 = vpop.f32.mrb[7].mxu0  ;;  %796 = vmatprep.subr.bf16.mxu1 %v770_v0 }
 0x12a   :  { %v171_v35 = vadd.f32 %v489_v13, %v170_v34  ;;  %648 = vmatprep.mubr.f32.mxu1 %v183_v30 }
 0x12b   :  { %649 = vmatmul.mubr.f32.gmra.mrb[4].mxu1 %v184_v32  ;;  %v186_v37 = vmax.f32 %v176_v33, 0.0 }
 0x12c   :  { %v185_v36 = vmax.f32 %v171_v35, 0.0  ;;  %804 = vmatpush3.bf16.msra.mxu1 %v770_v0 }
 0x12d   :  { %797 = vmatprep.subr.bf16.mxu1 %v774_v3 }
 0x12e   :  { %651 = vmatprep.mubr.f32.mxu1 %v185_v36 }
 0x12f   :  { %652 = vmatmul.mubr.f32.gmra.mrb[6].mxu1 %v186_v37 }
 0x130   :  { %805 = vmatpush3.bf16.msra.mxu1 %v774_v3 }
 0x131   :  { %798 = vmatprep.subr.bf16.mxu1 %v778_v6 }
 0x134   :  { %806 = vmatpush3.bf16.msra.mxu1 %v778_v6 }
 0x135   :  { %799 = vmatprep.subr.bf16.mxu1 %v782_v9 }
 0x138   :  { %807 = vmatpush3.bf16.msra.mxu1 %v782_v9 }
 0x139   :  { %800 = vmatprep.subr.bf16.mxu1 %v786_v12 }
 0x13c   :  { %808 = vmatpush3.bf16.msra.mxu1 %v786_v12 }
 0x13d   :  { %801 = vmatprep.subr.bf16.mxu1 %v790_v40 }
 0x140   :  { %809 = vmatpush3.bf16.msra.mxu1 %v790_v40 }
 0x1f6   :  { %v644_v42 = vpop.f32.mrb[0].mxu1 }
 0x1f7   :  { %v284_v43 = vadd.f32 %v644_v42, %v491_v41  ;;  %v278_v44 = vpop.f32.mrb[1].mxu1 }
 0x1f8   :  { %v279_v45 = vadd.f32 %v491_v41, %v278_v44 }
 0x1f9   :  { %v318_v48 = vmax.f32 %v284_v43, 0.0 }
 0x1fa   :  { %v317_v46 = vmax.f32 %v279_v45, 0.0  ;;  %v647_v47 = vpop.f32.mrb[2].mxu1 }
 0x1fb   :  { %v294_v49 = vadd.f32 %v647_v47, %v491_v41  ;;  %v288_v50 = vpop.f32.mrb[3].mxu1 }
 0x1fc   :  { %v289_v51 = vadd.f32 %v491_v41, %v288_v50  ;;  %686 = vmatprep.mubr.f32.mxu0 %v317_v46 }
 0x1fd   :  { %687 = vmatmul.mubr.f32.vlgmr.msra.gmra.mrb[8].mxu0 %v318_v48  ;;  %v320_v54 = vmax.f32 %v294_v49, 0.0 }
 0x1fe   :  { %v319_v52 = vmax.f32 %v289_v51, 0.0  ;;  %v650_v53 = vpop.f32.mrb[4].mxu1 }
 0x1ff   :  { %v304_v55 = vadd.f32 %v650_v53, %v491_v41  ;;  %v298_v56 = vpop.f32.mrb[5].mxu1 }
 0x200   :  { %v299_v57 = vadd.f32 %v491_v41, %v298_v56  ;;  %689 = vmatprep.mubr.f32.mxu0 %v319_v52 }
 0x201   :  { %690 = vmatmul.mubr.f32.gmra.mrb[10].mxu0 %v320_v54  ;;  %v322_v60 = vmax.f32 %v304_v55, 0.0 }
 0x202   :  { %v321_v58 = vmax.f32 %v299_v57, 0.0  ;;  %v653_v59 = vpop.f32.mrb[6].mxu1 }
 0x203   :  { %v314_v61 = vadd.f32 %v653_v59, %v491_v41  ;;  %v308_v62 = vpop.f32.mrb[7].mxu1 }
 0x204   :  { %v309_v63 = vadd.f32 %v491_v41, %v308_v62  ;;  %692 = vmatprep.mubr.f32.mxu1 %v321_v58 }
 0x205   :  { %693 = vmatmul.mubr.f32.vlgmr.msra.gmra.mrb[8].mxu1 %v322_v60  ;;  %v324_v1 = vmax.f32 %v314_v61, 0.0 }
 0x206   :  { %v323_v0 = vmax.f32 %v309_v63, 0.0 }
 0x208   :  { %695 = vmatprep.mubr.f32.mxu1 %v323_v0 }
 0x209   :  { %696 = vmatmul.mubr.f32.gmra.mrb[10].mxu1 %v324_v1 }
 0x2d0   :  { %v688_v3 = vpop.f32.mrb[8].mxu0 }
 0x2d1   :  { %v422_v4 = vadd.f32 %v688_v3, %v493_v2  ;;  %v416_v5 = vpop.f32.mrb[9].mxu0 }
 0x2d2   :  { %v417_v6 = vadd.f32 %v493_v2, %v416_v5 }
 0x2d3   :  { %815 = vtanh.f32 %v422_v4 }
 0x2d4   :  { %817 = vtanh.f32 %v417_v6  ;;  %v691_v7 = vpop.f32.mrb[10].mxu0 }
 0x2d5   :  { %v432_v8 = vadd.f32 %v691_v7, %v493_v2  ;;  %v426_v9 = vpop.f32.mrb[11].mxu0 }
 0x2d6   :  { %v427_v10 = vadd.f32 %v493_v2, %v426_v9 }
 0x2d7   :  { %819 = vtanh.f32 %v432_v8 }
 0x2d8   :  { %821 = vtanh.f32 %v427_v10  ;;  %v694_v11 = vpop.f32.mrb[8].mxu1 }
 0x2d9   :  { %v442_v12 = vadd.f32 %v694_v11, %v493_v2  ;;  %v436_v13 = vpop.f32.mrb[9].mxu1 }
 0x2da   :  { %v437_v14 = vadd.f32 %v493_v2, %v436_v13 }
 0x2db   :  { %823 = vtanh.f32 %v442_v12 }
 0x2dc   :  { %825 = vtanh.f32 %v437_v14  ;;  %v697_v15 = vpop.f32.mrb[10].mxu1 }
 0x2dd   :  { %v816_v16 = vpop.eup %815  ;;  %v452_v17 = vadd.f32 %v697_v15, %v493_v2  ;;  %v446_v18 = vpop.f32.mrb[11].mxu1 }
 0x2de   :  { %v818_v19 = vpop.eup %817  ;;  %464 = vst [vmem:[#allocation7 + $0x8] sm:$0xff] %v816_v16  ;;  %v447_v20 = vadd.f32 %v493_v2, %v446_v18 }
 0x2df   :  { %463 = vst [vmem:[#allocation7] sm:$0xff] %v818_v19  ;;  %827 = vtanh.f32 %v452_v17 }
 0x2e0   :  { %829 = vtanh.f32 %v447_v20 }
 0x2e1   :  { %v820_v21 = vpop.eup %819 }
 0x2e2   :  { %v822_v22 = vpop.eup %821  ;;  %466 = vst [vmem:[#allocation7 + $0x18] sm:$0xff] %v820_v21 }
 0x2e3   :  { %465 = vst [vmem:[#allocation7 + $0x10] sm:$0xff] %v822_v22 }
 0x2e5   :  { %v824_v23 = vpop.eup %823 }
 0x2e6   :  { %v826_v24 = vpop.eup %825  ;;  %468 = vst [vmem:[#allocation7 + $0x28] sm:$0xff] %v824_v23 }
 0x2e7   :  { %467 = vst [vmem:[#allocation7 + $0x20] sm:$0xff] %v826_v24 }
 0x2e9   :  { %v828_v25 = vpop.eup %827 }
 0x2ea   :  { %v830_v26 = vpop.eup %829  ;;  %470 = vst [vmem:[#allocation7 + $0x38] sm:$0xff] %v828_v25 }
 0x2eb   :  { %469 = vst [vmem:[#allocation7 + $0x30] sm:$0xff] %v830_v26 }
 0x2ec   :  { %886 = shalt.err (!%p883_p6)
}
 0x2ed   :  { %s887_s19 = scalar_lea.hbm %s985_s3, 1024 }
 0x2ee   :  { %p888_p7 = scmp.ne.s32.totalorder %s985_s3, %s887_s19  ;;  %p891_p8 = scmp.lt.u32.totalorder %s887_s19, %s985_s3 }
 0x2f0   :  { %p893_p9 = pnand %p891_p8, %p888_p7 }
 0x2f2   :  { %896 = shalt.err (!%p893_p9)
}
 0x2f3   :  { %482 = dma.vmem_to_hbm [thread:$0]  %s477_s15, 1024, %s985_s3, [#allocation4], %s904_s22, %s904_s22, %s905_s23  }
 0x2f4   :  { %901 = dma.done.wait [#allocation4], 1024  }
 0x2f5   :  { %902 = vsyncadd [#allocation4], 4294966272 }
 0x2f6   :  { %486 = vsyncpa [#allocation3], 1 }
 0x2f7   :  { %487 = vsyncpa [#allocation6], 1 }
 0x2f8   :  { %488 = vsyncpa [#allocation4], 1 }

</bundles_post_ra>
